<compile_context>
chip_gen: v7x
topology: tpu7x:2x2x1
jax: 0.10.0
libtpu: 0.0.40
codegen_flags: <defaults>
</compile_context>

<pallas_src>
import jax
import jax.numpy as jnp
from jax.experimental import pallas as pl
from jax.experimental.pallas import tpu as pltpu


def _round_up(n, m):
    return ((n + m - 1) // m) * m


def _dense_vpu(w, x, b):
    """y = W @ x + b as an unrolled broadcast-FMA on the VPU.

    Shapes: w (OUT, K), x (K, TB), b (OUT, 1) -> (OUT, TB).  K/OUT are tiny
    and static, so the Python loop fully unrolls at trace time.
    """
    out_dim, k_dim = w.shape
    acc = jnp.broadcast_to(b, (out_dim, x.shape[1]))
    for k in range(k_dim):  # K <= 16
        acc = acc + w[:, k:k + 1] * x[k:k + 1, :]
    return acc


def critic_kernel(x_ref, w1_ref, b1_ref, w2_ref, b2_ref, w3_ref, b3_ref, o_ref):
    x = x_ref[...]                                                    # (state_dim, TB) f32
    h1 = jnp.maximum(_dense_vpu(w1_ref[...], x, b1_ref[...]), 0.0)    # (16, TB)
    h2 = jnp.maximum(_dense_vpu(w2_ref[...], h1, b2_ref[...]), 0.0)   # (16, TB)
    v = _dense_vpu(w3_ref[...], h2, b3_ref[...])                      # (1, TB)
    o_ref[...] = v.astype(o_ref.dtype)                                # lane-dense store


def critic_forward(state, params, block_b=512):
    """state: (B, state_dim) f32 -> (B, 1) f32. params in torch (out, in) layout."""
    w1, b1, w2, b2, w3, b3 = params
    B, state_dim = state.shape

    # Batch tile: lane-dense (multiple of 128), capped at block_b (~512 rows is
    # the measured roofline sweet spot); pad the ragged tail and discard it.
    TB = min(block_b, _round_up(B, 128))
    B_pad = _round_up(B, TB)
    grid = (B_pad // TB,)

    # Batch on the lane axis.
    x_t = jnp.pad(state.T, ((0, 0), (0, B_pad - B)))                  # (state_dim, B_pad)

    const = lambda i: (0, 0)  # weights/biases: same block every step -> resident in VMEM
    param_bytes = sum(p.size * p.dtype.itemsize for p in params)
    cost = pl.CostEstimate(
        flops=2 * B_pad * (state_dim * 16 + 16 * 16 + 16),
        transcendentals=0,
        bytes_accessed=x_t.size * 4 + B_pad * 4 + param_bytes,
    )

    out_pad = pl.pallas_call(
        critic_kernel,
        out_shape=jax.ShapeDtypeStruct((1, B_pad), jnp.float32),
        grid=grid,
        in_specs=[
            pl.BlockSpec((state_dim, TB), lambda i: (0, i)),
            pl.BlockSpec(w1.shape, const),
            pl.BlockSpec(b1.shape, const),
            pl.BlockSpec(w2.shape, const),
            pl.BlockSpec(b2.shape, const),
            pl.BlockSpec(w3.shape, const),
            pl.BlockSpec(b3.shape, const),
        ],
        out_specs=pl.BlockSpec((1, TB), lambda i: (0, i)),
        compiler_params=pltpu.CompilerParams(
            dimension_semantics=("parallel",)),
        cost_estimate=cost,
    )(x_t, w1, b1, w2, b2, w3, b3)

    return out_pad[0, :B][:, None]                                    # (B, 1)


def init_critic_params(key, state_dim):
    """Torch-layout params: W (out, in), b (out, 1); uniform(-1/sqrt(fan_in), ...)."""
    def linear(k, fan_in, fan_out):
        kw, kb = jax.random.split(k)
        bound = 1.0 / jnp.sqrt(fan_in)
        w = jax.random.uniform(kw, (fan_out, fan_in), jnp.float32, -bound, bound)
        b = jax.random.uniform(kb, (fan_out, 1), jnp.float32, -bound, bound)
        return w, b

    k1, k2, k3 = jax.random.split(key, 3)
    w1, b1 = linear(k1, state_dim, 16)
    w2, b2 = linear(k2, 16, 16)
    w3, b3 = linear(k3, 16, 1)
    return w1, b1, w2, b2, w3, b3


def critic_reference(state, params):
    w1, b1, w2, b2, w3, b3 = params
    h1 = jnp.maximum(state @ w1.T + b1.T, 0.0)
    h2 = jnp.maximum(h1 @ w2.T + b2.T, 0.0)
    return h2 @ w3.T + b3.T


if __name__ == "__main__":
    key = jax.random.PRNGKey(0)
    k_params, k_state = jax.random.split(key)

    batch, state_dim = 8, 4
    params = init_critic_params(k_params, state_dim)
    state = jax.random.normal(k_state, (batch, state_dim), jnp.float32)

    out = jax.block_until_ready(critic_forward(state, params))
    ref = critic_reference(state, params)

    assert out.shape == (batch, 1)
    assert jnp.allclose(out, ref, atol=1e-5, rtol=1e-5)

    print("KERNEL_OK")
</pallas_src>

<mosaic_0001>
module attributes {stable_mosaic.version = 11 : i64} {
  func.func @critic_kernel(%arg0: i32, %arg1: memref<4x128xf32, #tpu.memory_space<vmem>>, %arg2: memref<16x4xf32, #tpu.memory_space<vmem>>, %arg3: memref<16x1xf32, #tpu.memory_space<vmem>>, %arg4: memref<16x16xf32, #tpu.memory_space<vmem>>, %arg5: memref<16x1xf32, #tpu.memory_space<vmem>>, %arg6: memref<1x16xf32, #tpu.memory_space<vmem>>, %arg7: memref<1x1xf32, #tpu.memory_space<vmem>>, %arg8: memref<1x128xf32, #tpu.memory_space<vmem>>) attributes {dimension_semantics = [#tpu.dimension_semantics<parallel>], iteration_bounds = array<i64: 1>, scalar_prefetch = 0 : i64, scratch_operands = 0 : i64, tpu.core_type = #tpu.core_type<tc>, window_params = [{transform_indices = @transform_0, window_bounds = array<i64: 4, 128>}, {pipeline_mode = #tpu.pipeline_mode<synchronous>, transform_indices = @transform_1, window_bounds = array<i64: 16, 4>}, {pipeline_mode = #tpu.pipeline_mode<synchronous>, transform_indices = @transform_2, window_bounds = array<i64: 16, 1>}, {pipeline_mode = #tpu.pipeline_mode<synchronous>, transform_indices = @transform_3, window_bounds = array<i64: 16, 16>}, {pipeline_mode = #tpu.pipeline_mode<synchronous>, transform_indices = @transform_4, window_bounds = array<i64: 16, 1>}, {pipeline_mode = #tpu.pipeline_mode<synchronous>, transform_indices = @transform_5, window_bounds = array<i64: 1, 16>}, {pipeline_mode = #tpu.pipeline_mode<synchronous>, transform_indices = @transform_6, window_bounds = array<i64: 1, 1>}, {transform_indices = @transform_7, window_bounds = array<i64: 1, 128>}]} {
    %c0 = arith.constant 0 : index
    %c0_0 = arith.constant 0 : index
    %0 = vector.load %arg1[%c0, %c0_0] : memref<4x128xf32, #tpu.memory_space<vmem>>, vector<4x128xf32>
    %c0_1 = arith.constant 0 : index
    %c0_2 = arith.constant 0 : index
    %1 = vector.load %arg2[%c0_1, %c0_2] : memref<16x4xf32, #tpu.memory_space<vmem>>, vector<16x4xf32>
    %c0_3 = arith.constant 0 : index
    %c0_4 = arith.constant 0 : index
    %2 = vector.load %arg3[%c0_3, %c0_4] : memref<16x1xf32, #tpu.memory_space<vmem>>, vector<16x1xf32>
    %3 = vector.shape_cast %2 : vector<16x1xf32> to vector<16x1xf32>
    %4 = vector.broadcast %3 : vector<16x1xf32> to vector<16x128xf32>
    %5 = vector.extract_strided_slice %1 {offsets = [0, 0], sizes = [16, 1], strides = [1, 1]} : vector<16x4xf32> to vector<16x1xf32>
    %6 = vector.extract_strided_slice %0 {offsets = [0, 0], sizes = [1, 128], strides = [1, 1]} : vector<4x128xf32> to vector<1x128xf32>
    %7 = vector.broadcast %5 : vector<16x1xf32> to vector<16x128xf32>
    %8 = vector.broadcast %6 : vector<1x128xf32> to vector<16x128xf32>
    %9 = arith.mulf %7, %8 : vector<16x128xf32>
    %10 = arith.addf %4, %9 : vector<16x128xf32>
    %11 = vector.extract_strided_slice %1 {offsets = [0, 1], sizes = [16, 1], strides = [1, 1]} : vector<16x4xf32> to vector<16x1xf32>
    %12 = vector.extract_strided_slice %0 {offsets = [1, 0], sizes = [1, 128], strides = [1, 1]} : vector<4x128xf32> to vector<1x128xf32>
    %13 = vector.broadcast %11 : vector<16x1xf32> to vector<16x128xf32>
    %14 = vector.broadcast %12 : vector<1x128xf32> to vector<16x128xf32>
    %15 = arith.mulf %13, %14 : vector<16x128xf32>
    %16 = arith.addf %10, %15 : vector<16x128xf32>
    %17 = vector.extract_strided_slice %1 {offsets = [0, 2], sizes = [16, 1], strides = [1, 1]} : vector<16x4xf32> to vector<16x1xf32>
    %18 = vector.extract_strided_slice %0 {offsets = [2, 0], sizes = [1, 128], strides = [1, 1]} : vector<4x128xf32> to vector<1x128xf32>
    %19 = vector.broadcast %17 : vector<16x1xf32> to vector<16x128xf32>
    %20 = vector.broadcast %18 : vector<1x128xf32> to vector<16x128xf32>
    %21 = arith.mulf %19, %20 : vector<16x128xf32>
    %22 = arith.addf %16, %21 : vector<16x128xf32>
    %23 = vector.extract_strided_slice %1 {offsets = [0, 3], sizes = [16, 1], strides = [1, 1]} : vector<16x4xf32> to vector<16x1xf32>
    %24 = vector.extract_strided_slice %0 {offsets = [3, 0], sizes = [1, 128], strides = [1, 1]} : vector<4x128xf32> to vector<1x128xf32>
    %25 = vector.broadcast %23 : vector<16x1xf32> to vector<16x128xf32>
    %26 = vector.broadcast %24 : vector<1x128xf32> to vector<16x128xf32>
    %27 = arith.mulf %25, %26 : vector<16x128xf32>
    %28 = arith.addf %22, %27 : vector<16x128xf32>
    %cst = arith.constant 0.000000e+00 : f32
    %29 = vector.broadcast %cst : f32 to vector<16x128xf32>
    %30 = arith.maximumf %28, %29 : vector<16x128xf32>
    %c0_5 = arith.constant 0 : index
    %c0_6 = arith.constant 0 : index
    %31 = vector.load %arg4[%c0_5, %c0_6] : memref<16x16xf32, #tpu.memory_space<vmem>>, vector<16x16xf32>
    %c0_7 = arith.constant 0 : index
    %c0_8 = arith.constant 0 : index
    %32 = vector.load %arg5[%c0_7, %c0_8] : memref<16x1xf32, #tpu.memory_space<vmem>>, vector<16x1xf32>
    %33 = vector.shape_cast %32 : vector<16x1xf32> to vector<16x1xf32>
    %34 = vector.broadcast %33 : vector<16x1xf32> to vector<16x128xf32>
    %35 = vector.extract_strided_slice %31 {offsets = [0, 0], sizes = [16, 1], strides = [1, 1]} : vector<16x16xf32> to vector<16x1xf32>
    %36 = vector.extract_strided_slice %30 {offsets = [0, 0], sizes = [1, 128], strides = [1, 1]} : vector<16x128xf32> to vector<1x128xf32>
    %37 = vector.broadcast %35 : vector<16x1xf32> to vector<16x128xf32>
    %38 = vector.broadcast %36 : vector<1x128xf32> to vector<16x128xf32>
    %39 = arith.mulf %37, %38 : vector<16x128xf32>
    %40 = arith.addf %34, %39 : vector<16x128xf32>
    %41 = vector.extract_strided_slice %31 {offsets = [0, 1], sizes = [16, 1], strides = [1, 1]} : vector<16x16xf32> to vector<16x1xf32>
    %42 = vector.extract_strided_slice %30 {offsets = [1, 0], sizes = [1, 128], strides = [1, 1]} : vector<16x128xf32> to vector<1x128xf32>
    %43 = vector.broadcast %41 : vector<16x1xf32> to vector<16x128xf32>
    %44 = vector.broadcast %42 : vector<1x128xf32> to vector<16x128xf32>
    %45 = arith.mulf %43, %44 : vector<16x128xf32>
    %46 = arith.addf %40, %45 : vector<16x128xf32>
    %47 = vector.extract_strided_slice %31 {offsets = [0, 2], sizes = [16, 1], strides = [1, 1]} : vector<16x16xf32> to vector<16x1xf32>
    %48 = vector.extract_strided_slice %30 {offsets = [2, 0], sizes = [1, 128], strides = [1, 1]} : vector<16x128xf32> to vector<1x128xf32>
    %49 = vector.broadcast %47 : vector<16x1xf32> to vector<16x128xf32>
    %50 = vector.broadcast %48 : vector<1x128xf32> to vector<16x128xf32>
    %51 = arith.mulf %49, %50 : vector<16x128xf32>
    %52 = arith.addf %46, %51 : vector<16x128xf32>
    %53 = vector.extract_strided_slice %31 {offsets = [0, 3], sizes = [16, 1], strides = [1, 1]} : vector<16x16xf32> to vector<16x1xf32>
    %54 = vector.extract_strided_slice %30 {offsets = [3, 0], sizes = [1, 128], strides = [1, 1]} : vector<16x128xf32> to vector<1x128xf32>
    %55 = vector.broadcast %53 : vector<16x1xf32> to vector<16x128xf32>
    %56 = vector.broadcast %54 : vector<1x128xf32> to vector<16x128xf32>
    %57 = arith.mulf %55, %56 : vector<16x128xf32>
    %58 = arith.addf %52, %57 : vector<16x128xf32>
    %59 = vector.extract_strided_slice %31 {offsets = [0, 4], sizes = [16, 1], strides = [1, 1]} : vector<16x16xf32> to vector<16x1xf32>
    %60 = vector.extract_strided_slice %30 {offsets = [4, 0], sizes = [1, 128], strides = [1, 1]} : vector<16x128xf32> to vector<1x128xf32>
    %61 = vector.broadcast %59 : vector<16x1xf32> to vector<16x128xf32>
    %62 = vector.broadcast %60 : vector<1x128xf32> to vector<16x128xf32>
    %63 = arith.mulf %61, %62 : vector<16x128xf32>
    %64 = arith.addf %58, %63 : vector<16x128xf32>
    %65 = vector.extract_strided_slice %31 {offsets = [0, 5], sizes = [16, 1], strides = [1, 1]} : vector<16x16xf32> to vector<16x1xf32>
    %66 = vector.extract_strided_slice %30 {offsets = [5, 0], sizes = [1, 128], strides = [1, 1]} : vector<16x128xf32> to vector<1x128xf32>
    %67 = vector.broadcast %65 : vector<16x1xf32> to vector<16x128xf32>
    %68 = vector.broadcast %66 : vector<1x128xf32> to vector<16x128xf32>
    %69 = arith.mulf %67, %68 : vector<16x128xf32>
    %70 = arith.addf %64, %69 : vector<16x128xf32>
    %71 = vector.extract_strided_slice %31 {offsets = [0, 6], sizes = [16, 1], strides = [1, 1]} : vector<16x16xf32> to vector<16x1xf32>
    %72 = vector.extract_strided_slice %30 {offsets = [6, 0], sizes = [1, 128], strides = [1, 1]} : vector<16x128xf32> to vector<1x128xf32>
    %73 = vector.broadcast %71 : vector<16x1xf32> to vector<16x128xf32>
    %74 = vector.broadcast %72 : vector<1x128xf32> to vector<16x128xf32>
    %75 = arith.mulf %73, %74 : vector<16x128xf32>
    %76 = arith.addf %70, %75 : vector<16x128xf32>
    %77 = vector.extract_strided_slice %31 {offsets = [0, 7], sizes = [16, 1], strides = [1, 1]} : vector<16x16xf32> to vector<16x1xf32>
    %78 = vector.extract_strided_slice %30 {offsets = [7, 0], sizes = [1, 128], strides = [1, 1]} : vector<16x128xf32> to vector<1x128xf32>
    %79 = vector.broadcast %77 : vector<16x1xf32> to vector<16x128xf32>
    %80 = vector.broadcast %78 : vector<1x128xf32> to vector<16x128xf32>
    %81 = arith.mulf %79, %80 : vector<16x128xf32>
    %82 = arith.addf %76, %81 : vector<16x128xf32>
    %83 = vector.extract_strided_slice %31 {offsets = [0, 8], sizes = [16, 1], strides = [1, 1]} : vector<16x16xf32> to vector<16x1xf32>
    %84 = vector.extract_strided_slice %30 {offsets = [8, 0], sizes = [1, 128], strides = [1, 1]} : vector<16x128xf32> to vector<1x128xf32>
    %85 = vector.broadcast %83 : vector<16x1xf32> to vector<16x128xf32>
    %86 = vector.broadcast %84 : vector<1x128xf32> to vector<16x128xf32>
    %87 = arith.mulf %85, %86 : vector<16x128xf32>
    %88 = arith.addf %82, %87 : vector<16x128xf32>
    %89 = vector.extract_strided_slice %31 {offsets = [0, 9], sizes = [16, 1], strides = [1, 1]} : vector<16x16xf32> to vector<16x1xf32>
    %90 = vector.extract_strided_slice %30 {offsets = [9, 0], sizes = [1, 128], strides = [1, 1]} : vector<16x128xf32> to vector<1x128xf32>
    %91 = vector.broadcast %89 : vector<16x1xf32> to vector<16x128xf32>
    %92 = vector.broadcast %90 : vector<1x128xf32> to vector<16x128xf32>
    %93 = arith.mulf %91, %92 : vector<16x128xf32>
    %94 = arith.addf %88, %93 : vector<16x128xf32>
    %95 = vector.extract_strided_slice %31 {offsets = [0, 10], sizes = [16, 1], strides = [1, 1]} : vector<16x16xf32> to vector<16x1xf32>
    %96 = vector.extract_strided_slice %30 {offsets = [10, 0], sizes = [1, 128], strides = [1, 1]} : vector<16x128xf32> to vector<1x128xf32>
    %97 = vector.broadcast %95 : vector<16x1xf32> to vector<16x128xf32>
    %98 = vector.broadcast %96 : vector<1x128xf32> to vector<16x128xf32>
    %99 = arith.mulf %97, %98 : vector<16x128xf32>
    %100 = arith.addf %94, %99 : vector<16x128xf32>
    %101 = vector.extract_strided_slice %31 {offsets = [0, 11], sizes = [16, 1], strides = [1, 1]} : vector<16x16xf32> to vector<16x1xf32>
    %102 = vector.extract_strided_slice %30 {offsets = [11, 0], sizes = [1, 128], strides = [1, 1]} : vector<16x128xf32> to vector<1x128xf32>
    %103 = vector.broadcast %101 : vector<16x1xf32> to vector<16x128xf32>
    %104 = vector.broadcast %102 : vector<1x128xf32> to vector<16x128xf32>
    %105 = arith.mulf %103, %104 : vector<16x128xf32>
    %106 = arith.addf %100, %105 : vector<16x128xf32>
    %107 = vector.extract_strided_slice %31 {offsets = [0, 12], sizes = [16, 1], strides = [1, 1]} : vector<16x16xf32> to vector<16x1xf32>
    %108 = vector.extract_strided_slice %30 {offsets = [12, 0], sizes = [1, 128], strides = [1, 1]} : vector<16x128xf32> to vector<1x128xf32>
    %109 = vector.broadcast %107 : vector<16x1xf32> to vector<16x128xf32>
    %110 = vector.broadcast %108 : vector<1x128xf32> to vector<16x128xf32>
    %111 = arith.mulf %109, %110 : vector<16x128xf32>
    %112 = arith.addf %106, %111 : vector<16x128xf32>
    %113 = vector.extract_strided_slice %31 {offsets = [0, 13], sizes = [16, 1], strides = [1, 1]} : vector<16x16xf32> to vector<16x1xf32>
    %114 = vector.extract_strided_slice %30 {offsets = [13, 0], sizes = [1, 128], strides = [1, 1]} : vector<16x128xf32> to vector<1x128xf32>
    %115 = vector.broadcast %113 : vector<16x1xf32> to vector<16x128xf32>
    %116 = vector.broadcast %114 : vector<1x128xf32> to vector<16x128xf32>
    %117 = arith.mulf %115, %116 : vector<16x128xf32>
    %118 = arith.addf %112, %117 : vector<16x128xf32>
    %119 = vector.extract_strided_slice %31 {offsets = [0, 14], sizes = [16, 1], strides = [1, 1]} : vector<16x16xf32> to vector<16x1xf32>
    %120 = vector.extract_strided_slice %30 {offsets = [14, 0], sizes = [1, 128], strides = [1, 1]} : vector<16x128xf32> to vector<1x128xf32>
    %121 = vector.broadcast %119 : vector<16x1xf32> to vector<16x128xf32>
    %122 = vector.broadcast %120 : vector<1x128xf32> to vector<16x128xf32>
    %123 = arith.mulf %121, %122 : vector<16x128xf32>
    %124 = arith.addf %118, %123 : vector<16x128xf32>
    %125 = vector.extract_strided_slice %31 {offsets = [0, 15], sizes = [16, 1], strides = [1, 1]} : vector<16x16xf32> to vector<16x1xf32>
    %126 = vector.extract_strided_slice %30 {offsets = [15, 0], sizes = [1, 128], strides = [1, 1]} : vector<16x128xf32> to vector<1x128xf32>
    %127 = vector.broadcast %125 : vector<16x1xf32> to vector<16x128xf32>
    %128 = vector.broadcast %126 : vector<1x128xf32> to vector<16x128xf32>
    %129 = arith.mulf %127, %128 : vector<16x128xf32>
    %130 = arith.addf %124, %129 : vector<16x128xf32>
    %cst_9 = arith.constant 0.000000e+00 : f32
    %131 = vector.broadcast %cst_9 : f32 to vector<16x128xf32>
    %132 = arith.maximumf %130, %131 : vector<16x128xf32>
    %c0_10 = arith.constant 0 : index
    %c0_11 = arith.constant 0 : index
    %133 = vector.load %arg6[%c0_10, %c0_11] : memref<1x16xf32, #tpu.memory_space<vmem>>, vector<1x16xf32>
    %c0_12 = arith.constant 0 : index
    %c0_13 = arith.constant 0 : index
    %134 = vector.load %arg7[%c0_12, %c0_13] : memref<1x1xf32, #tpu.memory_space<vmem>>, vector<1x1xf32>
    %135 = vector.shape_cast %134 : vector<1x1xf32> to vector<1x1xf32>
    %136 = vector.broadcast %135 : vector<1x1xf32> to vector<1x128xf32>
    %137 = vector.extract_strided_slice %133 {offsets = [0, 0], sizes = [1, 1], strides = [1, 1]} : vector<1x16xf32> to vector<1x1xf32>
    %138 = vector.extract_strided_slice %132 {offsets = [0, 0], sizes = [1, 128], strides = [1, 1]} : vector<16x128xf32> to vector<1x128xf32>
    %139 = vector.broadcast %137 : vector<1x1xf32> to vector<1x128xf32>
    %140 = arith.mulf %139, %138 : vector<1x128xf32>
    %141 = arith.addf %136, %140 : vector<1x128xf32>
    %142 = vector.extract_strided_slice %133 {offsets = [0, 1], sizes = [1, 1], strides = [1, 1]} : vector<1x16xf32> to vector<1x1xf32>
    %143 = vector.extract_strided_slice %132 {offsets = [1, 0], sizes = [1, 128], strides = [1, 1]} : vector<16x128xf32> to vector<1x128xf32>
    %144 = vector.broadcast %142 : vector<1x1xf32> to vector<1x128xf32>
    %145 = arith.mulf %144, %143 : vector<1x128xf32>
    %146 = arith.addf %141, %145 : vector<1x128xf32>
    %147 = vector.extract_strided_slice %133 {offsets = [0, 2], sizes = [1, 1], strides = [1, 1]} : vector<1x16xf32> to vector<1x1xf32>
    %148 = vector.extract_strided_slice %132 {offsets = [2, 0], sizes = [1, 128], strides = [1, 1]} : vector<16x128xf32> to vector<1x128xf32>
    %149 = vector.broadcast %147 : vector<1x1xf32> to vector<1x128xf32>
    %150 = arith.mulf %149, %148 : vector<1x128xf32>
    %151 = arith.addf %146, %150 : vector<1x128xf32>
    %152 = vector.extract_strided_slice %133 {offsets = [0, 3], sizes = [1, 1], strides = [1, 1]} : vector<1x16xf32> to vector<1x1xf32>
    %153 = vector.extract_strided_slice %132 {offsets = [3, 0], sizes = [1, 128], strides = [1, 1]} : vector<16x128xf32> to vector<1x128xf32>
    %154 = vector.broadcast %152 : vector<1x1xf32> to vector<1x128xf32>
    %155 = arith.mulf %154, %153 : vector<1x128xf32>
    %156 = arith.addf %151, %155 : vector<1x128xf32>
    %157 = vector.extract_strided_slice %133 {offsets = [0, 4], sizes = [1, 1], strides = [1, 1]} : vector<1x16xf32> to vector<1x1xf32>
    %158 = vector.extract_strided_slice %132 {offsets = [4, 0], sizes = [1, 128], strides = [1, 1]} : vector<16x128xf32> to vector<1x128xf32>
    %159 = vector.broadcast %157 : vector<1x1xf32> to vector<1x128xf32>
    %160 = arith.mulf %159, %158 : vector<1x128xf32>
    %161 = arith.addf %156, %160 : vector<1x128xf32>
    %162 = vector.extract_strided_slice %133 {offsets = [0, 5], sizes = [1, 1], strides = [1, 1]} : vector<1x16xf32> to vector<1x1xf32>
    %163 = vector.extract_strided_slice %132 {offsets = [5, 0], sizes = [1, 128], strides = [1, 1]} : vector<16x128xf32> to vector<1x128xf32>
    %164 = vector.broadcast %162 : vector<1x1xf32> to vector<1x128xf32>
    %165 = arith.mulf %164, %163 : vector<1x128xf32>
    %166 = arith.addf %161, %165 : vector<1x128xf32>
    %167 = vector.extract_strided_slice %133 {offsets = [0, 6], sizes = [1, 1], strides = [1, 1]} : vector<1x16xf32> to vector<1x1xf32>
    %168 = vector.extract_strided_slice %132 {offsets = [6, 0], sizes = [1, 128], strides = [1, 1]} : vector<16x128xf32> to vector<1x128xf32>
    %169 = vector.broadcast %167 : vector<1x1xf32> to vector<1x128xf32>
    %170 = arith.mulf %169, %168 : vector<1x128xf32>
    %171 = arith.addf %166, %170 : vector<1x128xf32>
    %172 = vector.extract_strided_slice %133 {offsets = [0, 7], sizes = [1, 1], strides = [1, 1]} : vector<1x16xf32> to vector<1x1xf32>
    %173 = vector.extract_strided_slice %132 {offsets = [7, 0], sizes = [1, 128], strides = [1, 1]} : vector<16x128xf32> to vector<1x128xf32>
    %174 = vector.broadcast %172 : vector<1x1xf32> to vector<1x128xf32>
    %175 = arith.mulf %174, %173 : vector<1x128xf32>
    %176 = arith.addf %171, %175 : vector<1x128xf32>
    %177 = vector.extract_strided_slice %133 {offsets = [0, 8], sizes = [1, 1], strides = [1, 1]} : vector<1x16xf32> to vector<1x1xf32>
    %178 = vector.extract_strided_slice %132 {offsets = [8, 0], sizes = [1, 128], strides = [1, 1]} : vector<16x128xf32> to vector<1x128xf32>
    %179 = vector.broadcast %177 : vector<1x1xf32> to vector<1x128xf32>
    %180 = arith.mulf %179, %178 : vector<1x128xf32>
    %181 = arith.addf %176, %180 : vector<1x128xf32>
    %182 = vector.extract_strided_slice %133 {offsets = [0, 9], sizes = [1, 1], strides = [1, 1]} : vector<1x16xf32> to vector<1x1xf32>
    %183 = vector.extract_strided_slice %132 {offsets = [9, 0], sizes = [1, 128], strides = [1, 1]} : vector<16x128xf32> to vector<1x128xf32>
    %184 = vector.broadcast %182 : vector<1x1xf32> to vector<1x128xf32>
    %185 = arith.mulf %184, %183 : vector<1x128xf32>
    %186 = arith.addf %181, %185 : vector<1x128xf32>
    %187 = vector.extract_strided_slice %133 {offsets = [0, 10], sizes = [1, 1], strides = [1, 1]} : vector<1x16xf32> to vector<1x1xf32>
    %188 = vector.extract_strided_slice %132 {offsets = [10, 0], sizes = [1, 128], strides = [1, 1]} : vector<16x128xf32> to vector<1x128xf32>
    %189 = vector.broadcast %187 : vector<1x1xf32> to vector<1x128xf32>
    %190 = arith.mulf %189, %188 : vector<1x128xf32>
    %191 = arith.addf %186, %190 : vector<1x128xf32>
    %192 = vector.extract_strided_slice %133 {offsets = [0, 11], sizes = [1, 1], strides = [1, 1]} : vector<1x16xf32> to vector<1x1xf32>
    %193 = vector.extract_strided_slice %132 {offsets = [11, 0], sizes = [1, 128], strides = [1, 1]} : vector<16x128xf32> to vector<1x128xf32>
    %194 = vector.broadcast %192 : vector<1x1xf32> to vector<1x128xf32>
    %195 = arith.mulf %194, %193 : vector<1x128xf32>
    %196 = arith.addf %191, %195 : vector<1x128xf32>
    %197 = vector.extract_strided_slice %133 {offsets = [0, 12], sizes = [1, 1], strides = [1, 1]} : vector<1x16xf32> to vector<1x1xf32>
    %198 = vector.extract_strided_slice %132 {offsets = [12, 0], sizes = [1, 128], strides = [1, 1]} : vector<16x128xf32> to vector<1x128xf32>
    %199 = vector.broadcast %197 : vector<1x1xf32> to vector<1x128xf32>
    %200 = arith.mulf %199, %198 : vector<1x128xf32>
    %201 = arith.addf %196, %200 : vector<1x128xf32>
    %202 = vector.extract_strided_slice %133 {offsets = [0, 13], sizes = [1, 1], strides = [1, 1]} : vector<1x16xf32> to vector<1x1xf32>
    %203 = vector.extract_strided_slice %132 {offsets = [13, 0], sizes = [1, 128], strides = [1, 1]} : vector<16x128xf32> to vector<1x128xf32>
    %204 = vector.broadcast %202 : vector<1x1xf32> to vector<1x128xf32>
    %205 = arith.mulf %204, %203 : vector<1x128xf32>
    %206 = arith.addf %201, %205 : vector<1x128xf32>
    %207 = vector.extract_strided_slice %133 {offsets = [0, 14], sizes = [1, 1], strides = [1, 1]} : vector<1x16xf32> to vector<1x1xf32>
    %208 = vector.extract_strided_slice %132 {offsets = [14, 0], sizes = [1, 128], strides = [1, 1]} : vector<16x128xf32> to vector<1x128xf32>
    %209 = vector.broadcast %207 : vector<1x1xf32> to vector<1x128xf32>
    %210 = arith.mulf %209, %208 : vector<1x128xf32>
    %211 = arith.addf %206, %210 : vector<1x128xf32>
    %212 = vector.extract_strided_slice %133 {offsets = [0, 15], sizes = [1, 1], strides = [1, 1]} : vector<1x16xf32> to vector<1x1xf32>
    %213 = vector.extract_strided_slice %132 {offsets = [15, 0], sizes = [1, 128], strides = [1, 1]} : vector<16x128xf32> to vector<1x128xf32>
    %214 = vector.broadcast %212 : vector<1x1xf32> to vector<1x128xf32>
    %215 = arith.mulf %214, %213 : vector<1x128xf32>
    %216 = arith.addf %211, %215 : vector<1x128xf32>
    %c0_14 = arith.constant 0 : index
    %c0_15 = arith.constant 0 : index
    %217 = vector.load %arg8[%c0_14, %c0_15] : memref<1x128xf32, #tpu.memory_space<vmem>>, vector<1x128xf32>
    tpu.vector_store %arg8[%c0_14, %c0_15], %216 {strides = array<i32>} : memref<1x128xf32, #tpu.memory_space<vmem>>, vector<1x128xf32>,
    return
  }
  func.func @transform_0(%arg0: i32) -> (i32, i32) {
    %c0_i32 = arith.constant 0 : i32
    %c0_i32_0 = arith.constant 0 : i32
    return %c0_i32, %arg0 : i32, i32
  }
  func.func @transform_1(%arg0: i32) -> (i32, i32) {
    %c0_i32 = arith.constant 0 : i32
    %c0_i32_0 = arith.constant 0 : i32
    %c0_i32_1 = arith.constant 0 : i32
    return %c0_i32, %c0_i32_0 : i32, i32
  }
  func.func @transform_2(%arg0: i32) -> (i32, i32) {
    %c0_i32 = arith.constant 0 : i32
    %c0_i32_0 = arith.constant 0 : i32
    %c0_i32_1 = arith.constant 0 : i32
    return %c0_i32, %c0_i32_0 : i32, i32
  }
  func.func @transform_3(%arg0: i32) -> (i32, i32) {
    %c0_i32 = arith.constant 0 : i32
    %c0_i32_0 = arith.constant 0 : i32
    %c0_i32_1 = arith.constant 0 : i32
    return %c0_i32, %c0_i32_0 : i32, i32
  }
  func.func @transform_4(%arg0: i32) -> (i32, i32) {
    %c0_i32 = arith.constant 0 : i32
    %c0_i32_0 = arith.constant 0 : i32
    %c0_i32_1 = arith.constant 0 : i32
    return %c0_i32, %c0_i32_0 : i32, i32
  }
  func.func @transform_5(%arg0: i32) -> (i32, i32) {
    %c0_i32 = arith.constant 0 : i32
    %c0_i32_0 = arith.constant 0 : i32
    %c0_i32_1 = arith.constant 0 : i32
    return %c0_i32, %c0_i32_0 : i32, i32
  }
  func.func @transform_6(%arg0: i32) -> (i32, i32) {
    %c0_i32 = arith.constant 0 : i32
    %c0_i32_0 = arith.constant 0 : i32
    %c0_i32_1 = arith.constant 0 : i32
    return %c0_i32, %c0_i32_0 : i32, i32
  }
  func.func @transform_7(%arg0: i32) -> (i32, i32) {
    %c0_i32 = arith.constant 0 : i32
    %c0_i32_0 = arith.constant 0 : i32
    return %c0_i32, %arg0 : i32, i32
  }
}

</mosaic_0001>

<bundles_post_ra>
// kernel: tpu_custom_call.1
= control target key start
LH: loop header
LB: loop body
LE: loop exit
PB: predicated region body
PF: predicated region fallthrough
CT: control target
= control target key end

     0   :  { %s963_s0 = inlined_call_operand.vmem [shape: f32[4,128], index: 0, kind: input, shape index: {}]   ;;  %s964_s1 = inlined_call_operand.vmem [shape: f32[16,4], index: 1, kind: input, shape index: {}]   ;;  %s965_s2 = inlined_call_operand.vmem [shape: f32[16,1], index: 2, kind: input, shape index: {}]   ;;  %s966_s3 = inlined_call_operand.vmem [shape: f32[16,16], index: 3, kind: input, shape index: {}]   ;;  %s967_s4 = inlined_call_operand.vmem [shape: f32[16,1], index: 4, kind: input, shape index: {}]   ;;  %s968_s5 = inlined_call_operand.vmem [shape: f32[1,16], index: 5, kind: input, shape index: {}]   ;;  %s969_s6 = inlined_call_operand.<no memory space> [shape: f32[1,1], index: 6, kind: input, shape index: {}]   ;;  %s970_s7 = inlined_call_operand.hbm [shape: f32[1,128], index: 7, kind: output, shape index: {}]  }
   0x1   :  { %v12_v0 = vstv %s969_s6 }
   0x2   :  { %13 = vst [vmem:[#allocation2] sm:$0x1] %v12_v0 }
   0x3   :  { %v30_v1 = vld [vmem:[%s964_s1] sm:$0xff]  ;;  %v707_v2 = vmov 1   ;;  %v708_v3 = vmov 0   ;;  %v31_v4 = vld [vmem:[%s964_s1 + $0x8] sm:$0xff] }
   0x4   :  { %633 = vset.pattern.permute.xlu0 %v707_v2  ;;  %632 = vset.pattern.permute.xlu1 %v708_v3 }
   0x5   :  { %63 = vperm.xlu0 %633, %v30_v1   ;;  %46 = vperm.xlu1 %632, %v30_v1  }
   0x6   :  { %14 = vsyncpa [#allocation4], 0  ;;  %v709_v5 = vmov 2   ;;  %v32_v6 = vld [vmem:[%s965_s2] sm:$0xff]  ;;  %v33_v7 = vld [vmem:[%s965_s2 + $0x8] sm:$0xff]  ;;  %v710_v9 = vmov 3   ;;  %v54_v26 = vlaneseq }
   0x7   :  { %v114_v8 = vld [vmem:[%s967_s4] sm:$0xff]  ;;  %v792_v10 = vld [vmem:[%s966_s3 + $0x8] sm:$0xff]  ;;  %v711_v13 = vmov 4   ;;  %v712_v14 = vmov 6   ;;  %v713_v15 = vmov 7   ;;  %v714_v16 = vmov 9  }
   0x8   :  { %v798_v11 = vld [vmem:[%s966_s3] sm:$0xff]  ;;  %v115_v12 = vld [vmem:[%s967_s4 + $0x8] sm:$0xff]  ;;  %v715_v17 = vmov 11   ;;  %v716_v18 = vmov 14   ;;  %v717_v19 = vmov 5   ;;  %v718_v21 = vmov 12  }
   0x9   :  { %636 = vset.pattern.permute.xlu0 %v709_v5  ;;  %51 = vperm.xlu1 %632, %v31_v4   ;;  %v833_v20 = vld [vmem:[%s968_s5] sm:$0x1]  ;;  %v719_v22 = vmov 8   ;;  %v720_v23 = vmov 15   ;;  %v721_v24 = vmov 10   ;;  %v722_v25 = vmov 13  }
   0xa   :  { %83 = vperm.xlu0 %636, %v31_v4   ;;  %v387_v27 = vld [vmem:[#allocation2] sm:$0x1]  ;;  %v864_v28 = vshrl.u32 %v54_v26, 7 }
   0xb   :  { %v29_v32 = vld [vmem:[%s963_s0] sm:$0xf]  ;;  %s723_s0 = smov [#allocation3]  }
   0xc   :  { %v867_v31 = vsub.s32 0, %v864_v28  ;;  %v875_v33 = vsub.s32 1, %v864_v28  ;;  %v881_v38 = vsub.s32 2, %v864_v28  ;;  %v888_v45 = vsub.s32 3, %v864_v28  ;;  %s607_s17 = sshll.u32 %s723_s0, 4  ;;  %s608_s17 = int_to_ptr.vmem [resolvable:$true] %s607_s17 }
   0xd   :  { %634 = vset.pattern.permute.xlu1 %v707_v2  ;;  %s683_s18 = scalar_lea.vmem %s608_s17, 16  ;;  %s687_s19 = scalar_lea.vmem %s608_s17, 32 }
   0xe   :  { %637 = vset.pattern.permute.xlu0 %v708_v3  ;;  %67 = vperm.xlu1 %634, %v31_v4   ;;  %v57_v35 = vrot.slane %v29_v32, %v867_v31  ;;  %v73_v37 = vrot.slane %v29_v32, %v875_v33  ;;  %v89_v43 = vrot.slane %v29_v32, %v881_v38  ;;  %p684_p0 = scmp.ne.s32.totalorder %s608_s17, %s683_s18  ;;  %p688_p1 = scmp.lt.s32.totalorder %s608_s17, %s608_s17 }
   0xf   :  { %36 = vperm.xlu0 %637, %v32_v6   ;;  %v105_v53 = vrot.slane %v29_v32, %v888_v45  ;;  %p689_p2 = scmp.lt.s32.totalorder %s687_s19, %s683_s18 }
  0x11   :  { %p690_p3 = por %p689_p2, %p688_p1 }
  0x12   :  { %635 = vset.pattern.permute.xlu1 %v709_v5 }
  0x13   :  { %41 = vperm.xlu0 %637, %v33_v7   ;;  %79 = vperm.xlu1 %635, %v30_v1   ;;  %p691_p4 = pnand %p690_p3, %p684_p0 }
  0x17   :  { %118 = vperm.xlu0 %637, %v114_v8   ;;  %638 = vset.pattern.permute.xlu1 %v710_v9 }
  0x18   :  { %95 = vperm.xlu1 %638, %v30_v1  }
  0x1b   :  { %133 = vperm.xlu0 %637, %v792_v10  }
  0x1c   :  { %99 = vperm.xlu1 %638, %v31_v4  }
  0x1f   :  { %642 = vset.pattern.permute.xlu0 %v710_v9 }
  0x20   :  { %177 = vperm.xlu0 %642, %v798_v11   ;;  %639 = vset.pattern.permute.xlu1 %v708_v3 }
  0x21   :  { %123 = vperm.xlu1 %639, %v115_v12  }
  0x24   :  { %645 = vset.pattern.permute.xlu0 %v711_v13 }
  0x25   :  { %197 = vperm.xlu0 %645, %v792_v10   ;;  %128 = vperm.xlu1 %639, %v798_v11  }
  0x29   :  { %647 = vset.pattern.permute.xlu0 %v712_v14  ;;  %640 = vset.pattern.permute.xlu1 %v707_v2 }
  0x2a   :  { %225 = vperm.xlu0 %647, %v798_v11   ;;  %145 = vperm.xlu1 %640, %v798_v11  }
  0x2e   :  { %650 = vset.pattern.permute.xlu0 %v713_v15  ;;  %641 = vset.pattern.permute.xlu1 %v709_v5 }
  0x2f   :  { %245 = vperm.xlu0 %650, %v792_v10   ;;  %161 = vperm.xlu1 %641, %v798_v11  }
  0x33   :  { %652 = vset.pattern.permute.xlu0 %v714_v16  ;;  %165 = vperm.xlu1 %641, %v792_v10  }
  0x34   :  { %273 = vperm.xlu0 %652, %v798_v11  }
  0x37   :  { %643 = vset.pattern.permute.xlu1 %v710_v9 }
  0x38   :  { %655 = vset.pattern.permute.xlu0 %v715_v17  ;;  %181 = vperm.xlu1 %643, %v792_v10  }
  0x39   :  { %305 = vperm.xlu0 %655, %v798_v11  }
  0x3c   :  { %644 = vset.pattern.permute.xlu1 %v711_v13 }
  0x3d   :  { %658 = vset.pattern.permute.xlu0 %v716_v18  ;;  %193 = vperm.xlu1 %644, %v798_v11  }
  0x3e   :  { %353 = vperm.xlu0 %658, %v798_v11  }
  0x41   :  { %646 = vset.pattern.permute.xlu1 %v717_v19 }
  0x42   :  { %659 = vset.pattern.permute.xlu0 %v707_v2  ;;  %209 = vperm.xlu1 %646, %v798_v11  }
  0x43   :  { %149 = vperm.xlu0 %659, %v792_v10  }
  0x46   :  { %213 = vperm.xlu1 %646, %v792_v10  }
  0x47   :  { %409 = vperm.xlu0 %659, %v833_v20  }
  0x4a   :  { %648 = vset.pattern.permute.xlu1 %v712_v14 }
  0x4b   :  { %664 = vset.pattern.permute.xlu0 %v709_v5  ;;  %229 = vperm.xlu1 %648, %v792_v10  }
  0x4c   :  { %422 = vperm.xlu0 %664, %v833_v20  }
  0x4f   :  { %649 = vset.pattern.permute.xlu1 %v713_v15 }
  0x50   :  { %667 = vset.pattern.permute.xlu0 %v718_v21  ;;  %241 = vperm.xlu1 %649, %v798_v11  }
  0x51   :  { %325 = vperm.xlu0 %667, %v792_v10  }
  0x54   :  { %651 = vset.pattern.permute.xlu1 %v719_v22 }
  0x55   :  { %670 = vset.pattern.permute.xlu0 %v717_v19  ;;  %257 = vperm.xlu1 %651, %v798_v11  }
  0x56   :  { %461 = vperm.xlu0 %670, %v833_v20  }
  0x59   :  { %261 = vperm.xlu1 %651, %v792_v10  }
  0x5a   :  { %673 = vset.pattern.permute.xlu0 %v720_v23 }
  0x5b   :  { %373 = vperm.xlu0 %673, %v792_v10  }
  0x5d   :  { %653 = vset.pattern.permute.xlu1 %v714_v16 }
  0x5e   :  { %277 = vperm.xlu1 %653, %v792_v10  }
  0x5f   :  { %676 = vset.pattern.permute.xlu0 %v714_v16 }
  0x60   :  { %510 = vperm.xlu0 %676, %v833_v20  }
  0x62   :  { %654 = vset.pattern.permute.xlu1 %v721_v24 }
  0x63   :  { %289 = vperm.xlu1 %654, %v798_v11  }
  0x64   :  { %679 = vset.pattern.permute.xlu0 %v718_v21 }
  0x65   :  { %549 = vperm.xlu0 %679, %v833_v20  }
  0x67   :  { %656 = vset.pattern.permute.xlu1 %v718_v21 }
  0x68   :  { %321 = vperm.xlu1 %656, %v798_v11  }
  0x69   :  { %682 = vset.pattern.permute.xlu0 %v720_v23 }
  0x6a   :  { %588 = vperm.xlu0 %682, %v833_v20  }
  0x6c   :  { %657 = vset.pattern.permute.xlu1 %v722_v25 }
  0x6d   :  { %337 = vperm.xlu1 %657, %v798_v11  }
  0x71   :  { %660 = vset.pattern.permute.xlu1 %v720_v23 }
  0x72   :  { %369 = vperm.xlu1 %660, %v798_v11  }
  0x76   :  { %661 = vset.pattern.permute.xlu1 %v708_v3 }
  0x77   :  { %399 = vperm.xlu1 %661, %v833_v20  }
  0x7b   :  { %662 = vset.pattern.permute.xlu1 %v721_v24 }
  0x7c   :  { %293 = vperm.xlu1 %662, %v792_v10  }
  0x80   :  { %663 = vset.pattern.permute.xlu1 %v708_v3 }
  0x81   :  { %390 = vperm.xlu1 %663, %v387_v27  }
  0x84   :  { %v47_v29 = vpop.permute.xlu1 %46  ;;  %v64_v30 = vpop.permute.xlu0 %63 }
  0x85   :  { %665 = vset.pattern.permute.xlu1 %v715_v17  ;;  %v58_v39 = vmul.f32 %v57_v35, %v47_v29  ;;  %v74_v42 = vmul.f32 %v73_v37, %v64_v30 }
  0x86   :  { %309 = vperm.xlu1 %665, %v792_v10  }
  0x88   :  { %v52_v34 = vpop.permute.xlu1 %51 }
  0x89   :  { %v84_v36 = vpop.permute.xlu0 %83  ;;  %v59_v46 = vmul.f32 %v57_v35, %v52_v34 }
  0x8a   :  { %666 = vset.pattern.permute.xlu1 %v710_v9  ;;  %v91_v58 = vmul.f32 %v89_v43, %v84_v36 }
  0x8b   :  { %435 = vperm.xlu1 %666, %v833_v20  }
  0x8d   :  { %v68_v40 = vpop.permute.xlu1 %67 }
  0x8e   :  { %v37_v41 = vpop.permute.xlu0 %36  ;;  %v75_v49 = vmul.f32 %v73_v37, %v68_v40 }
  0x8f   :  { %v60_v44 = vadd.f32 %v58_v39, %v37_v41  ;;  %668 = vset.pattern.permute.xlu1 %v711_v13  ;;  %v218_v41 = vsub.s32 5, %v864_v28 }
  0x90   :  { %448 = vperm.xlu1 %668, %v833_v20  }
  0x91   :  { %v76_v50 = vadd.f32 %v74_v42, %v60_v44  ;;  %v234_v44 = vsub.s32 6, %v864_v28 }
  0x92   :  { %v42_v47 = vpop.permute.xlu0 %41  ;;  %v80_v48 = vpop.permute.xlu1 %79 }
  0x93   :  { %v61_v51 = vadd.f32 %v59_v46, %v42_v47  ;;  %v90_v52 = vmul.f32 %v89_v43, %v80_v48 }
  0x94   :  { %669 = vset.pattern.permute.xlu1 %v722_v25 }
  0x95   :  { %v77_v54 = vadd.f32 %v75_v49, %v61_v51  ;;  %v92_v55 = vadd.f32 %v90_v52, %v76_v50  ;;  %341 = vperm.xlu1 %669, %v792_v10  }
  0x96   :  { %v119_v56 = vpop.permute.xlu0 %118 }
  0x97   :  { %v96_v57 = vpop.permute.xlu1 %95  ;;  %v93_v0 = vadd.f32 %v91_v58, %v77_v54 }
  0x98   :  { %v106_v59 = vmul.f32 %v105_v53, %v96_v57 }
  0x99   :  { %671 = vset.pattern.permute.xlu1 %v716_v18 }
  0x9a   :  { %v108_v60 = vadd.f32 %v106_v59, %v92_v55  ;;  %357 = vperm.xlu1 %671, %v792_v10   ;;  %v134_v61 = vpop.permute.xlu0 %133 }
  0x9b   :  { %v100_v62 = vpop.permute.xlu1 %99 }
  0x9c   :  { %v895_v63 = vmax.f32 %v108_v60, 0.0  ;;  %v107_v1 = vmul.f32 %v105_v53, %v100_v62 }
  0x9e   :  { %v139_v2 = vrot.slane %v895_v63, %v867_v31  ;;  %v899_v3 = vadd.f32 %v107_v1, %v93_v0  ;;  %672 = vset.pattern.permute.xlu1 %v712_v14  ;;  %v155_v11 = vrot.slane %v895_v63, %v875_v33  ;;  %v171_v21 = vrot.slane %v895_v63, %v881_v38 }
  0x9f   :  { %v178_v4 = vpop.permute.xlu0 %177  ;;  %474 = vperm.xlu1 %672, %v833_v20   ;;  %v235_v48 = vrot.slane %v895_v63, %v234_v44 }
  0xa0   :  { %v141_v5 = vmul.f32 %v139_v2, %v134_v61  ;;  %v124_v6 = vpop.permute.xlu1 %123 }
  0xa2   :  { %v143_v7 = vadd.f32 %v141_v5, %v124_v6 }
  0xa3   :  { %674 = vset.pattern.permute.xlu1 %v713_v15  ;;  %v187_v15 = vrot.slane %v895_v63, %v888_v45 }
  0xa4   :  { %v198_v8 = vpop.permute.xlu0 %197  ;;  %487 = vperm.xlu1 %674, %v833_v20   ;;  %v129_v9 = vpop.permute.xlu1 %128 }
  0xa5   :  { %v140_v10 = vmul.f32 %v139_v2, %v129_v9  ;;  %v188_v27 = vmul.f32 %v187_v15, %v178_v4  ;;  %v111_v2 = vmax.f32 %v899_v3, 0.0 }
  0xa7   :  { %v142_v14 = vadd.f32 %v140_v10, %v119_v56 }
  0xa8   :  { %675 = vset.pattern.permute.xlu1 %v719_v22 }
  0xa9   :  { %v226_v12 = vpop.permute.xlu0 %225  ;;  %500 = vperm.xlu1 %675, %v833_v20   ;;  %v146_v13 = vpop.permute.xlu1 %145 }
  0xaa   :  { %v156_v16 = vmul.f32 %v155_v11, %v146_v13  ;;  %v236_v52 = vmul.f32 %v235_v48, %v226_v12 }
  0xac   :  { %v158_v19 = vadd.f32 %v156_v16, %v142_v14 }
  0xad   :  { %677 = vset.pattern.permute.xlu1 %v721_v24  ;;  %v202_v24 = vsub.s32 4, %v864_v28 }
  0xae   :  { %v246_v23 = vpop.permute.xlu0 %245  ;;  %523 = vperm.xlu1 %677, %v833_v20   ;;  %v162_v22 = vpop.permute.xlu1 %161 }
  0xaf   :  { %v172_v26 = vmul.f32 %v171_v21, %v162_v22  ;;  %v203_v40 = vrot.slane %v895_v63, %v202_v24  ;;  %v299_v22 = vrot.slane %v111_v2, %v881_v38 }
  0xb1   :  { %v174_v29 = vadd.f32 %v172_v26, %v158_v19  ;;  %v205_v57 = vmul.f32 %v203_v40, %v198_v8  ;;  %v267_v8 = vrot.slane %v111_v2, %v867_v31 }
  0xb2   :  { %678 = vset.pattern.permute.xlu1 %v715_v17  ;;  %v166_v30 = vpop.permute.xlu1 %165 }
  0xb3   :  { %v173_v32 = vmul.f32 %v171_v21, %v166_v30  ;;  %v274_v34 = vpop.permute.xlu0 %273  ;;  %536 = vperm.xlu1 %678, %v833_v20   ;;  %v190_v35 = vadd.f32 %v188_v27, %v174_v29  ;;  %v315_v27 = vrot.slane %v111_v2, %v888_v45 }
  0xb7   :  { %680 = vset.pattern.permute.xlu1 %v722_v25  ;;  %v182_v36 = vpop.permute.xlu1 %181  ;;  %v219_v25 = vrot.slane %v895_v63, %v218_v41 }
  0xb8   :  { %v189_v37 = vmul.f32 %v187_v15, %v182_v36  ;;  %v306_v39 = vpop.permute.xlu0 %305  ;;  %562 = vperm.xlu1 %680, %v833_v20  }
  0xb9   :  { %v316_v30 = vmul.f32 %v315_v27, %v306_v39 }
  0xbc   :  { %681 = vset.pattern.permute.xlu1 %v716_v18  ;;  %v194_v17 = vpop.permute.xlu1 %193 }
  0xbd   :  { %v204_v42 = vmul.f32 %v203_v40, %v194_v17  ;;  %v354_v43 = vpop.permute.xlu0 %353  ;;  %575 = vperm.xlu1 %681, %v833_v20   ;;  %v250_v20 = vsub.s32 7, %v864_v28  ;;  %v283_v28 = vrot.slane %v111_v2, %v875_v33  ;;  %v347_v40 = vrot.slane %v111_v2, %v218_v41 }
  0xbf   :  { %v206_v46 = vadd.f32 %v204_v42, %v190_v35  ;;  %v251_v62 = vrot.slane %v895_v63, %v250_v20  ;;  %v284_v13 = vmul.f32 %v283_v28, %v274_v34  ;;  %v331_v35 = vrot.slane %v111_v2, %v202_v24 }
  0xc0   :  { %v363_v42 = vrot.slane %v111_v2, %v234_v44 }
  0xc1   :  { %v210_v47 = vpop.permute.xlu1 %209  ;;  %v253_v4 = vmul.f32 %v251_v62, %v246_v23 }
  0xc2   :  { %v220_v49 = vmul.f32 %v219_v25, %v210_v47  ;;  %v150_v50 = vpop.permute.xlu0 %149 }
  0xc3   :  { %v157_v51 = vmul.f32 %v155_v11, %v150_v50 }
  0xc4   :  { %v222_v18 = vadd.f32 %v220_v49, %v206_v46 }
  0xc5   :  { %v159_v53 = vadd.f32 %v157_v51, %v143_v7  ;;  %v214_v54 = vpop.permute.xlu1 %213 }
  0xc6   :  { %v238_v55 = vadd.f32 %v236_v52, %v222_v18  ;;  %v221_v61 = vmul.f32 %v219_v25, %v214_v54  ;;  %v364_v25 = vmul.f32 %v363_v42, %v354_v43  ;;  %v410_v52 = vpop.permute.xlu0 %409 }
  0xc7   :  { %v175_v56 = vadd.f32 %v173_v32, %v159_v53 }
  0xc9   :  { %v191_v58 = vadd.f32 %v189_v37, %v175_v56 }
  0xca   :  { %v230_v59 = vpop.permute.xlu1 %229 }
  0xcb   :  { %v207_v60 = vadd.f32 %v205_v57, %v191_v58  ;;  %v237_v1 = vmul.f32 %v235_v48, %v230_v59  ;;  %v379_v48 = vrot.slane %v111_v2, %v250_v20  ;;  %v423_v53 = vpop.permute.xlu0 %422  ;;  %v415_v20 = vrot.slane %v410_v52, %v867_v31 }
  0xcd   :  { %v223_v0 = vadd.f32 %v221_v61, %v207_v60 }
  0xcf   :  { %v239_v5 = vadd.f32 %v237_v1, %v223_v0  ;;  %v242_v6 = vpop.permute.xlu1 %241  ;;  %v428_v1 = vrot.slane %v423_v53, %v867_v31 }
  0xd0   :  { %v252_v7 = vmul.f32 %v251_v62, %v242_v6 }
  0xd1   :  { %v255_v9 = vadd.f32 %v253_v4, %v239_v5 }
  0xd2   :  { %v254_v10 = vadd.f32 %v252_v7, %v238_v55  ;;  %v326_v55 = vpop.permute.xlu0 %325 }
  0xd3   :  { %v333_v57 = vmul.f32 %v331_v35, %v326_v55 }
  0xd4   :  { %v258_v11 = vpop.permute.xlu1 %257 }
  0xd5   :  { %v268_v12 = vmul.f32 %v267_v8, %v258_v11 }
  0xd6   :  { %v462_v0 = vpop.permute.xlu0 %461 }
  0xd7   :  { %v270_v14 = vadd.f32 %v268_v12, %v254_v10 }
  0xd8   :  { %v262_v16 = vpop.permute.xlu1 %261 }
  0xd9   :  { %v269_v63 = vmul.f32 %v267_v8, %v262_v16  ;;  %v286_v19 = vadd.f32 %v284_v13, %v270_v14 }
  0xda   :  { %v374_v13 = vpop.permute.xlu0 %373 }
  0xdb   :  { %v271_v15 = vadd.f32 %v269_v63, %v255_v9 }
  0xdd   :  { %v278_v21 = vpop.permute.xlu1 %277 }
  0xde   :  { %v285_v3 = vmul.f32 %v283_v28, %v278_v21  ;;  %v381_v21 = vmul.f32 %v379_v48, %v374_v13 }
  0xe0   :  { %v287_v23 = vadd.f32 %v285_v3, %v271_v15  ;;  %v467_v15 = vrot.slane %v462_v0, %v867_v31 }
  0xe2   :  { %v290_v26 = vpop.permute.xlu1 %289 }
  0xe3   :  { %v300_v29 = vmul.f32 %v299_v22, %v290_v26 }
  0xe5   :  { %v302_v32 = vadd.f32 %v300_v29, %v286_v19 }
  0xe7   :  { %v322_v33 = vpop.permute.xlu1 %321  ;;  %v318_v36 = vadd.f32 %v316_v30, %v302_v32 }
  0xe8   :  { %v332_v34 = vmul.f32 %v331_v35, %v322_v33 }
  0xea   :  { %v334_v37 = vadd.f32 %v332_v34, %v318_v36 }
  0xec   :  { %v338_v17 = vpop.permute.xlu1 %337 }
  0xed   :  { %v348_v46 = vmul.f32 %v347_v40, %v338_v17 }
  0xef   :  { %v350_v47 = vadd.f32 %v348_v46, %v334_v37 }
  0xf1   :  { %v370_v49 = vpop.permute.xlu1 %369  ;;  %v366_v38 = vadd.f32 %v364_v25, %v350_v47 }
  0xf2   :  { %v380_v50 = vmul.f32 %v379_v48, %v370_v49 }
  0xf4   :  { %v382_v51 = vadd.f32 %v380_v50, %v366_v38 }
  0xf6   :  { %v400_v45 = vpop.permute.xlu1 %399  ;;  %v384_v60 = vmax.f32 %v382_v51, 0.0 }
  0xf7   :  { %v405_v61 = vrot.slane %v400_v45, %v867_v31 }
  0xf8   :  { %v416_v4 = vmul.f32 %v415_v20, %v384_v60  ;;  %v429_v28 = vmul.f32 %v428_v1, %v384_v60  ;;  %v468_v33 = vmul.f32 %v467_v15, %v384_v60 }
  0xf9   :  { %v406_v2 = vmul.f32 %v405_v61, %v384_v60 }
  0xfa   :  { %v418_v11 = vrot.slane %v416_v4, 1  ;;  %v431_v3 = vrot.slane %v429_v28, 2  ;;  %v470_v17 = vrot.slane %v468_v33, 5 }
  0xfb   :  { %v294_v39 = vpop.permute.xlu1 %293 }
  0xfc   :  { %v301_v18 = vmul.f32 %v299_v22, %v294_v39 }
  0xfe   :  { %v303_v24 = vadd.f32 %v301_v18, %v287_v23 }
 0x100   :  { %v391_v54 = vpop.permute.xlu1 %390 }
 0x101   :  { %v396_v62 = vrot.slane %v391_v54, %v867_v31 }
 0x103   :  { %v407_v9 = vadd.f32 %v406_v2, %v396_v62 }
 0x105   :  { %v310_v56 = vpop.permute.xlu1 %309  ;;  %v420_v16 = vadd.f32 %v418_v11, %v407_v9 }
 0x106   :  { %v317_v41 = vmul.f32 %v315_v27, %v310_v56 }
 0x107   :  { %v433_v26 = vadd.f32 %v431_v3, %v420_v16 }
 0x108   :  { %v319_v44 = vadd.f32 %v317_v41, %v303_v24 }
 0x10a   :  { %v436_v58 = vpop.permute.xlu1 %435  ;;  %v335_v43 = vadd.f32 %v333_v57, %v319_v44 }
 0x10b   :  { %v441_v5 = vrot.slane %v436_v58, %v867_v31 }
 0x10d   :  { %v442_v12 = vmul.f32 %v441_v5, %v384_v60 }
 0x10f   :  { %v449_v59 = vpop.permute.xlu1 %448  ;;  %v444_v23 = vrot.slane %v442_v12, 3 }
 0x110   :  { %v454_v10 = vrot.slane %v449_v59, %v867_v31 }
 0x111   :  { %v446_v35 = vadd.f32 %v444_v23, %v433_v26 }
 0x112   :  { %v455_v63 = vmul.f32 %v454_v10, %v384_v60 }
 0x114   :  { %v342_v6 = vpop.permute.xlu1 %341  ;;  %v457_v27 = vrot.slane %v455_v63, 4 }
 0x115   :  { %v349_v7 = vmul.f32 %v347_v40, %v342_v6  ;;  %v511_v40 = vpop.permute.xlu0 %510 }
 0x116   :  { %v459_v34 = vadd.f32 %v457_v27, %v446_v35  ;;  %v516_v25 = vrot.slane %v511_v40, %v867_v31 }
 0x117   :  { %v351_v8 = vadd.f32 %v349_v7, %v335_v43 }
 0x118   :  { %v472_v48 = vadd.f32 %v470_v17, %v459_v34 }
 0x119   :  { %v358_v14 = vpop.permute.xlu1 %357  ;;  %v550_v41 = vpop.permute.xlu0 %549 }
 0x11a   :  { %v365_v19 = vmul.f32 %v363_v42, %v358_v14  ;;  %v555_v44 = vrot.slane %v550_v41, %v867_v31 }
 0x11c   :  { %v367_v22 = vadd.f32 %v365_v19, %v351_v8 }
 0x11d   :  { %v589_v1 = vpop.permute.xlu0 %588 }
 0x11e   :  { %v383_v29 = vadd.f32 %v381_v21, %v367_v22  ;;  %v475_v30 = vpop.permute.xlu1 %474  ;;  %v594_v7 = vrot.slane %v589_v1, %v867_v31 }
 0x11f   :  { %v480_v32 = vrot.slane %v475_v30, %v867_v31 }
 0x120   :  { %v385_v47 = vmax.f32 %v383_v29, 0.0 }
 0x121   :  { %v481_v36 = vmul.f32 %v480_v32, %v384_v60 }
 0x122   :  { %v517_v52 = vmul.f32 %v516_v25, %v385_v47  ;;  %v595_v12 = vmul.f32 %v594_v7, %v385_v47 }
 0x123   :  { %v488_v37 = vpop.permute.xlu1 %487  ;;  %v483_v42 = vrot.slane %v481_v36, 6 }
 0x124   :  { %v493_v46 = vrot.slane %v488_v37, %v867_v31  ;;  %v519_v53 = vrot.slane %v517_v52, 1  ;;  %v597_v16 = vrot.slane %v595_v12, 7 }
 0x125   :  { %v485_v38 = vadd.f32 %v483_v42, %v472_v48 }
 0x126   :  { %v494_v49 = vmul.f32 %v493_v46, %v384_v60  ;;  %v556_v60 = vmul.f32 %v555_v44, %v385_v47 }
 0x128   :  { %v496_v50 = vrot.slane %v494_v49, 7  ;;  %v501_v51 = vpop.permute.xlu1 %500  ;;  %v558_v4 = vrot.slane %v556_v60, 4 }
 0x129   :  { %v506_v45 = vrot.slane %v501_v51, %v867_v31 }
 0x12a   :  { %v498_v39 = vadd.f32 %v496_v50, %v485_v38 }
 0x12b   :  { %v507_v18 = vmul.f32 %v506_v45, %v385_v47 }
 0x12d   :  { %v508_v24 = vadd.f32 %v507_v18, %v498_v39  ;;  %v524_v54 = vpop.permute.xlu1 %523 }
 0x12e   :  { %v529_v55 = vrot.slane %v524_v54, %v867_v31 }
 0x12f   :  { %v521_v56 = vadd.f32 %v519_v53, %v508_v24 }
 0x130   :  { %v530_v57 = vmul.f32 %v529_v55, %v385_v47 }
 0x132   :  { %v532_v58 = vrot.slane %v530_v57, 2  ;;  %v537_v43 = vpop.permute.xlu1 %536 }
 0x133   :  { %v542_v59 = vrot.slane %v537_v43, %v867_v31 }
 0x134   :  { %v534_v20 = vadd.f32 %v532_v58, %v521_v56 }
 0x135   :  { %v543_v61 = vmul.f32 %v542_v59, %v385_v47 }
 0x137   :  { %v545_v62 = vrot.slane %v543_v61, 3  ;;  %v563_v0 = vpop.permute.xlu1 %562 }
 0x138   :  { %v568_v2 = vrot.slane %v563_v0, %v867_v31 }
 0x139   :  { %v547_v5 = vadd.f32 %v545_v62, %v534_v20 }
 0x13a   :  { %v569_v6 = vmul.f32 %v568_v2, %v385_v47 }
 0x13b   :  { %v560_v9 = vadd.f32 %v558_v4, %v547_v5 }
 0x13c   :  { %v571_v10 = vrot.slane %v569_v6, 5  ;;  %v576_v8 = vpop.permute.xlu1 %575 }
 0x13d   :  { %v581_v11 = vrot.slane %v576_v8, %v867_v31 }
 0x13e   :  { %v573_v28 = vadd.f32 %v571_v10, %v560_v9 }
 0x13f   :  { %v582_v13 = vmul.f32 %v581_v11, %v385_v47 }
 0x141   :  { %v584_v14 = vrot.slane %v582_v13, 6 }
 0x143   :  { %v586_v63 = vadd.f32 %v584_v14, %v573_v28 }
 0x145   :  { %v599_v19 = vadd.f32 %v597_v16, %v586_v63 }
 0x147   :  { %600 = vst [vmem:[#allocation3] sm:$0x1] %v599_v19 }
 0x148   :  { %694 = shalt.err (!%p691_p4)
}
 0x149   :  { %s695_s22 = scalar_lea.hbm %s970_s7, 16 }
 0x14a   :  { %p696_p5 = scmp.ne.s32.totalorder %s970_s7, %s695_s22  ;;  %p699_p6 = scmp.lt.u32.totalorder %s695_s22, %s970_s7 }
 0x14c   :  { %p701_p7 = pnand %p699_p6, %p696_p5 }
 0x14e   :  { %704 = shalt.err (!%p701_p7)
}
 0x14f   :  { %610 = dma.vmem_to_hbm [thread:$0]  %s608_s17, 16, %s970_s7, [#allocation4]  }
 0x150   :  { %705 = dma.done.wait [#allocation4], 16  }
 0x151   :  { %706 = vsyncadd [#allocation4], 4294967280 }
 0x152   :  { %614 = vsyncpa [#allocation4], 1 }

</bundles_post_ra>
